<compile_context>
chip_gen: v7x
topology: tpu7x:2x2x1
jax: 0.10.0
libtpu: 0.0.40
codegen_flags: <defaults>
</compile_context>

<pallas_src>
import math

import jax
import jax.numpy as jnp
from jax.experimental import pallas as pl
from jax.experimental.pallas import tpu as pltpu


def _affine_kernel(x_ref, gamma_ref, beta_ref, o_ref):
    # x_ref: (TR, TC) tile; gamma_ref/beta_ref: (1, TC) -- broadcast over rows.
    o_ref[...] = (x_ref[...] * gamma_ref[...] + beta_ref[...]).astype(o_ref.dtype)


def _round_down(v, m):
    return (v // m) * m


def _round_up(v, m):
    return ((v + m - 1) // m) * m


def _tpu_caps():
    """Returns (vmem_capacity_bytes, tensorcores_per_chip, target_x_tile_bytes)."""
    vmem = 64 * 1024 * 1024          # conservative fallback: v7x per-TC VMEM
    cores_hint = None
    try:
        info = pltpu.get_tpu_info()
        vmem = int(info.vmem_capacity_bytes)
        cores_hint = getattr(info, "num_cores", None)
    except Exception:
        pass
    # Heuristic: 64 MiB/TC VMEM => v7x-class (2 TCs, ~3.2 TB/s HBM) => bigger
    # tiles so the ~0.35 us per-grid-step overhead stays <10% of traffic time.
    # 128 MiB VMEM => v5e/v6e single TC => 4 MiB tiles (measured 85% roofline
    # plateau on v6e).
    if vmem <= 64 * 1024 * 1024:
        num_cores, target = 2, 8 * 1024 * 1024
    else:
        num_cores, target = 1, 4 * 1024 * 1024
    if isinstance(cores_hint, int) and cores_hint > 0:
        num_cores = cores_hint
    return vmem, num_cores, target


def _choose_col_chunk(C, itemsize, q, target_tile_bytes):
    # Full width whenever a minimal q-row tile at full width fits the budget:
    # one fully contiguous HBM DMA per block, no repeated param DMAs, 1-D grid.
    if C * itemsize * q <= target_tile_bytes:
        return C
    max_lanes = max(128, _round_down(target_tile_bytes // (itemsize * q), 128))
    if C % 128 == 0:
        # Largest multiple-of-128 divisor of C that fits the budget: no partial
        # column blocks, no masked stores.
        units = C // 128
        best = 128
        for k in range(1, units + 1):
            lanes = k * 128
            if lanes > max_lanes:
                break
            if units % k == 0:
                best = lanes
        return best
    # Huge non-128-multiple C (rare): 128-aligned chunk, masked last block.
    return min(C, max_lanes)


def _affine_2d(x, gamma, beta, *, target_tile_bytes, num_cores, vmem_cap,
               donate_x=False):
    """x: (R, C); gamma/beta: (1, C). Returns x * gamma + beta, shape (R, C)."""
    R, C = x.shape
    itemsize = jnp.dtype(x.dtype).itemsize
    q = max(8, 32 // itemsize)       # sublane quantum: 8 f32 / 16 bf16 / 32 int8

    # --- column (lane) tiling -------------------------------------------------
    chunk_c = _choose_col_chunk(C, itemsize, q, target_tile_bytes)
    n_col = pl.cdiv(C, chunk_c)
    bytes_per_row = max(1, chunk_c * itemsize)

    # --- row tiling -------------------------------------------------------------
    tile_rows = max(q, _round_down(target_tile_bytes // bytes_per_row, q))

    # Generation-aware minimum number of row steps (pipelining on single-TC
    # chips, 2-way megacore sharding on v7x), but never shrink per-step tiles
    # below ~1 MiB just to manufacture grid steps.
    min_steps = 4 if num_cores >= 2 else 2
    min_tile_bytes = 1 << 20
    if R >= min_steps * q:
        cap = max(q, _round_up(pl.cdiv(R, min_steps), q))
        if cap * bytes_per_row >= min_tile_bytes:
            tile_rows = min(tile_rows, cap)

    if tile_rows >= R:
        tile_rows = R                 # full-extent block is always legal
    elif num_cores >= 2:
        # Keep the row-step count even so both TensorCores get equal tails.
        n_row = pl.cdiv(R, tile_rows)
        if n_row > 1 and n_row % 2 == 1:
            cand = max(q, _round_up(pl.cdiv(R, n_row + 1), q))
            if cand < R and pl.cdiv(R, cand) % 2 == 0:
                tile_rows = cand

    n_row = pl.cdiv(R, tile_rows)
    n_steps = n_row * n_col
    tile_bytes = tile_rows * chunk_c * itemsize
    param_bytes = chunk_c * jnp.dtype(gamma.dtype).itemsize

    def build_and_run(x_buffers):
        if n_col == 1:
            grid = (n_row,)
            x_shape, x_map = (tile_rows, chunk_c), (lambda i: (i, 0))
            p_shape, p_map = (1, chunk_c), (lambda i: (0, 0))
            dim_sem = ("parallel",)
        else:
            # Column axis slowest: the (1, chunk_c) gamma/beta blocks stay
            # resident across the whole inner row sweep (Pallas only re-DMAs a
            # block when its index changes).
            grid = (n_col, n_row)
            x_shape, x_map = (tile_rows, chunk_c), (lambda j, i: (i, j))
            p_shape, p_map = (1, chunk_c), (lambda j, i: (0, j))
            dim_sem = ("parallel", "parallel")

        if x_buffers > 2:
            x_spec = pl.BlockSpec(x_shape, x_map,
                                  pipeline_mode=pl.Buffered(x_buffers))
        else:
            x_spec = pl.BlockSpec(x_shape, x_map)

        # Explicit VMEM budget: x buffers + double-buffered out tile + params,
        # with headroom, capped below this generation's physical VMEM.
        need = (x_buffers + 2) * tile_bytes + 8 * param_bytes + (2 << 20)
        vmem_limit = int(min(max(need, 16 << 20), vmem_cap - (4 << 20)))

        return pl.pallas_call(
            _affine_kernel,
            out_shape=jax.ShapeDtypeStruct((R, C), x.dtype),
            grid_spec=pltpu.PrefetchScalarGridSpec(
                num_scalar_prefetch=0,
                grid=grid,
                in_specs=[x_spec,
                          pl.BlockSpec(p_shape, p_map),
                          pl.BlockSpec(p_shape, p_map)],
                out_specs=pl.BlockSpec(x_shape, x_map),
            ),
            compiler_params=pltpu.CompilerParams(
                dimension_semantics=dim_sem,
                vmem_limit_bytes=vmem_limit,
            ),
            input_output_aliases=({0: 0} if donate_x else {}),
        )(x, gamma, beta)

    if n_steps >= 3:
        # Triple-buffer the streaming x input to hide DMA jitter on this
        # DMA-bound kernel; fall back to default double buffering if this
        # Pallas build rejects pipeline_mode.
        try:
            return build_and_run(3)
        except Exception:
            pass
    return build_and_run(2)


def affine_transform(x, gamma, beta, *, target_tile_bytes=None, donate_x=False):
    """Pallas implementation of AffineTransformLayer.forward: x * gamma + beta.

    x:     (..., dim)
    gamma: (1, dim)
    beta:  (1, dim)
    """
    orig_shape = x.shape
    D = orig_shape[-1]
    assert gamma.shape == (1, D) and beta.shape == (1, D)

    vmem_cap, num_cores, default_target = _tpu_caps()
    if target_tile_bytes is None:
        target_tile_bytes = default_target

    x2 = x.reshape(-1, D)
    B = x2.shape[0]
    total = B * D

    if D % 128 != 0:
        # Lane-densify: the affine broadcast is periodic in D, so rows of
        # L = lcm(D, 128) lanes with gamma/beta tiled L//D times are exact and
        # turn masked vst.msk partial stores into full-width stores.
        L = (D * 128) // math.gcd(D, 128)
        if L <= 16384:
            reps = L // D
            gamma_work = jnp.tile(gamma, (1, reps))
            beta_work = jnp.tile(beta, (1, reps))
            pad = (-total) % L
            if pad == 0:
                out = _affine_2d(x2.reshape(-1, L), gamma_work, beta_work,
                                 target_tile_bytes=target_tile_bytes,
                                 num_cores=num_cores, vmem_cap=vmem_cap,
                                 donate_x=donate_x)
                return out.reshape(orig_shape)
            # Ragged tail: pad the flat stream (<= L-1 elements, one cheap
            # wrapper-side copy), run full-width, slice the result back.  The
            # padded temporary is dead afterwards, so donate it to the output.
            flat = jnp.pad(x2.reshape(-1), (0, pad))
            out = _affine_2d(flat.reshape(-1, L), gamma_work, beta_work,
                             target_tile_bytes=target_tile_bytes,
                             num_cores=num_cores, vmem_cap=vmem_cap,
                             donate_x=True)
            return out.reshape(-1)[:total].reshape(orig_shape)
        # TODO(synk): huge L (> 16K lanes) falls through to masked partial
        # stores; pad D itself up to a multiple of 128 if this path gets hot.

    out = _affine_2d(x2, gamma, beta, target_tile_bytes=target_tile_bytes,
                     num_cores=num_cores, vmem_cap=vmem_cap, donate_x=donate_x)
    return out.reshape(orig_shape)


if __name__ == "__main__":
    # Case 1: module-default parameters (gamma = ones(1, dim) * decay_factor,
    # beta = zeros(1, dim)) at a small shape; exercises lane-densify reshape.
    key = jax.random.PRNGKey(0)
    batch, dim = 8, 32
    decay_factor = 1.0
    gamma = jnp.ones((1, dim), dtype=jnp.float32) * decay_factor
    beta = jnp.zeros((1, dim), dtype=jnp.float32)
    x = jax.random.normal(key, (batch, dim), dtype=jnp.float32)

    out = jax.block_until_ready(affine_transform(x, gamma, beta))
    ref = x * gamma + beta
    assert out.shape == ref.shape
    assert jnp.allclose(out, ref, atol=1e-6), "mismatch vs reference (case 1)"

    # Case 2: lane-dense D, non-trivial gamma/beta, generation-default tiling.
    b2, d2 = 1024, 512
    k1, k2, k3 = jax.random.split(jax.random.PRNGKey(0), 3)
    x2 = jax.random.normal(k1, (b2, d2), dtype=jnp.float32)
    g2 = jax.random.normal(k2, (1, d2), dtype=jnp.float32)
    be2 = jax.random.normal(k3, (1, d2), dtype=jnp.float32)
    out2 = jax.block_until_ready(affine_transform(x2, g2, be2))
    assert jnp.allclose(out2, x2 * g2 + be2, atol=1e-5), "mismatch (case 2)"

    # Case 3: D not a multiple of 128 with a ragged tail -> padded densify
    # path (L = lcm(96, 128) = 384, 7*96 % 384 != 0) + donated temp.
    b3, d3 = 7, 96
    k4, k5, k6 = jax.random.split(jax.random.PRNGKey(1), 3)
    x3 = jax.random.normal(k4, (b3, d3), dtype=jnp.float32)
    g3 = jax.random.normal(k5, (1, d3), dtype=jnp.float32)
    be3 = jax.random.normal(k6, (1, d3), dtype=jnp.float32)
    out3 = jax.block_until_ready(affine_transform(x3, g3, be3))
    assert jnp.allclose(out3, x3 * g3 + be3, atol=1e-5), "mismatch (case 3)"

    # Case 4: same small tensor with a forced small tile target -> multi-step
    # row grid (exercises triple-buffered pipeline + even-step rounding).
    out4 = jax.block_until_ready(
        affine_transform(x2, g2, be2, target_tile_bytes=256 * 1024))
    assert jnp.allclose(out4, x2 * g2 + be2, atol=1e-5), "mismatch (case 4)"

    print("KERNEL_OK")
</pallas_src>

<mosaic_0001>
module attributes {stable_mosaic.version = 11 : i64} {
  func.func @_affine_kernel(%arg0: i32, %arg1: memref<2x128xf32, #tpu.memory_space<vmem>>, %arg2: memref<1x128xf32, #tpu.memory_space<vmem>>, %arg3: memref<1x128xf32, #tpu.memory_space<vmem>>, %arg4: memref<2x128xf32, #tpu.memory_space<vmem>>) attributes {dimension_semantics = [#tpu.dimension_semantics<parallel>], iteration_bounds = array<i64: 1>, scalar_prefetch = 0 : i64, scratch_operands = 0 : i64, tpu.core_type = #tpu.core_type<tc>, window_params = [{transform_indices = @transform_0, window_bounds = array<i64: 2, 128>}, {pipeline_mode = #tpu.pipeline_mode<synchronous>, transform_indices = @transform_1, window_bounds = array<i64: 1, 128>}, {pipeline_mode = #tpu.pipeline_mode<synchronous>, transform_indices = @transform_2, window_bounds = array<i64: 1, 128>}, {transform_indices = @transform_3, window_bounds = array<i64: 2, 128>}]} {
    %c0 = arith.constant 0 : index
    %c0_0 = arith.constant 0 : index
    %0 = vector.load %arg1[%c0, %c0_0] : memref<2x128xf32, #tpu.memory_space<vmem>>, vector<2x128xf32>
    %c0_1 = arith.constant 0 : index
    %c0_2 = arith.constant 0 : index
    %1 = vector.load %arg2[%c0_1, %c0_2] : memref<1x128xf32, #tpu.memory_space<vmem>>, vector<1x128xf32>
    %2 = vector.broadcast %1 : vector<1x128xf32> to vector<2x128xf32>
    %3 = arith.mulf %0, %2 : vector<2x128xf32>
    %c0_3 = arith.constant 0 : index
    %c0_4 = arith.constant 0 : index
    %4 = vector.load %arg3[%c0_3, %c0_4] : memref<1x128xf32, #tpu.memory_space<vmem>>, vector<1x128xf32>
    %5 = vector.broadcast %4 : vector<1x128xf32> to vector<2x128xf32>
    %6 = arith.addf %3, %5 : vector<2x128xf32>
    %c0_5 = arith.constant 0 : index
    %c0_6 = arith.constant 0 : index
    %7 = vector.load %arg4[%c0_5, %c0_6] : memref<2x128xf32, #tpu.memory_space<vmem>>, vector<2x128xf32>
    tpu.vector_store %arg4[%c0_5, %c0_6], %6 {strides = array<i32>} : memref<2x128xf32, #tpu.memory_space<vmem>>, vector<2x128xf32>,
    return
  }
  func.func @transform_0(%arg0: i32) -> (i32, i32) {
    %c0_i32 = arith.constant 0 : i32
    %c0_i32_0 = arith.constant 0 : i32
    return %arg0, %c0_i32 : i32, i32
  }
  func.func @transform_1(%arg0: i32) -> (i32, i32) {
    %c0_i32 = arith.constant 0 : i32
    %c0_i32_0 = arith.constant 0 : i32
    %c0_i32_1 = arith.constant 0 : i32
    return %c0_i32, %c0_i32_0 : i32, i32
  }
  func.func @transform_2(%arg0: i32) -> (i32, i32) {
    %c0_i32 = arith.constant 0 : i32
    %c0_i32_0 = arith.constant 0 : i32
    %c0_i32_1 = arith.constant 0 : i32
    return %c0_i32, %c0_i32_0 : i32, i32
  }
  func.func @transform_3(%arg0: i32) -> (i32, i32) {
    %c0_i32 = arith.constant 0 : i32
    %c0_i32_0 = arith.constant 0 : i32
    return %arg0, %c0_i32 : i32, i32
  }
}

</mosaic_0001>

<bundles_post_ra>
// kernel: tpu_custom_call.1
= control target key start
LH: loop header
LB: loop body
LE: loop exit
PB: predicated region body
PF: predicated region fallthrough
CT: control target
= control target key end

     0   :  { %8 = vsyncpa [#allocation3], 0  ;;  %s164_s0 = inlined_call_operand.hbm [shape: f32[2,128], index: 0, kind: input, shape index: {}]   ;;  %s165_s1 = inlined_call_operand.vmem [shape: f32[1,128], index: 1, kind: input, shape index: {}]   ;;  %s166_s2 = inlined_call_operand.vmem [shape: f32[1,128], index: 2, kind: input, shape index: {}]   ;;  %s167_s3 = inlined_call_operand.hbm [shape: f32[2,128], index: 3, kind: output, shape index: {}]  }
   0x1   :  { %9 = vsyncpa [#allocation4], 0  ;;  %s112_s12 = smov [#allocation2]   ;;  %s64_s16 = scalar_lea.hbm %s164_s0, 32 }
   0x2   :  { %s16_s13 = sshll.u32 %s112_s12, 4  ;;  %p65_p0 = scmp.ne.s32.totalorder %s164_s0, %s64_s16  ;;  %s17_s13 = int_to_ptr.vmem [resolvable:$true] %s16_s13 }
   0x3   :  { %p68_p1 = scmp.lt.u32.totalorder %s64_s16, %s164_s0 }
   0x5   :  { %p70_p2 = pnand %p68_p1, %p65_p0 }
   0x7   :  { %73 = shalt.err (!%p70_p2)
}
   0x8   :  { %s74_s21 = scalar_lea.vmem %s17_s13, 32  ;;  %p79_p4 = scmp.lt.s32.totalorder %s17_s13, %s17_s13 }
   0x9   :  { %p75_p3 = scmp.ne.s32.totalorder %s17_s13, %s74_s21  ;;  %p80_p5 = scmp.lt.s32.totalorder %s74_s21, %s74_s21 }
   0xb   :  { %p81_p6 = por %p80_p5, %p79_p4 }
   0xd   :  { %p82_p7 = pnand %p81_p6, %p75_p3 }
   0xf   :  { %85 = shalt.err (!%p82_p7)
}
  0x10   :  { %19 = dma.hbm_to_vmem [thread:$0]  %s164_s0, 32, %s17_s13, [#allocation3]  }
  0x11   :  { %108 = dma.done.wait [#allocation3], 32  }
  0x12   :  { %109 = vsyncadd [#allocation3], 4294967264  ;;  %s113_s24 = smov [#allocation5]   ;;  %v27_v0 = vld [vmem:[#allocation2] sm:$0x3] }
  0x13   :  { %s51_s25 = sshll.u32 %s113_s24, 4  ;;  %v60_v1 = vld [vmem:[%s165_s1] ss:$0 sm:$0xff]  ;;  %s52_s25 = int_to_ptr.vmem [resolvable:$true] %s51_s25 }
  0x14   :  { %v61_v2 = vld [vmem:[%s166_s2] ss:$0 sm:$0xff]  ;;  %v35_v3 = vmul.f32 %v60_v1, %v27_v0  ;;  %s86_s30 = scalar_lea.vmem %s52_s25, 32  ;;  %p91_p9 = scmp.lt.s32.totalorder %s52_s25, %s52_s25 }
  0x15   :  { %p87_p8 = scmp.ne.s32.totalorder %s52_s25, %s86_s30  ;;  %p92_p10 = scmp.lt.s32.totalorder %s86_s30, %s86_s30 }
  0x16   :  { %v43_v4 = vadd.f32 %v61_v2, %v35_v3 }
  0x17   :  { %p93_p11 = por %p92_p10, %p91_p9 }
  0x18   :  { %44 = vst [vmem:[#allocation5] sm:$0x3] %v43_v4 }
  0x19   :  { %p94_p12 = pnand %p93_p11, %p87_p8 }
  0x1b   :  { %97 = shalt.err (!%p94_p12)
}
  0x1c   :  { %s98_s5 = scalar_lea.hbm %s167_s3, 32 }
  0x1d   :  { %p99_p13 = scmp.ne.s32.totalorder %s167_s3, %s98_s5  ;;  %p102_p0 = scmp.lt.u32.totalorder %s98_s5, %s167_s3 }
  0x1f   :  { %p104_p1 = pnand %p102_p0, %p99_p13 }
  0x21   :  { %107 = shalt.err (!%p104_p1)
}
  0x22   :  { %54 = dma.vmem_to_hbm [thread:$0]  %s52_s25, 32, %s167_s3, [#allocation4]  }
  0x23   :  { %110 = dma.done.wait [#allocation4], 32  }
  0x24   :  { %111 = vsyncadd [#allocation4], 4294967264 }
  0x25   :  { %58 = vsyncpa [#allocation3], 1 }
  0x26   :  { %59 = vsyncpa [#allocation4], 1 }

</bundles_post_ra>
